<compile_context>
chip_gen: v7x
topology: tpu7x:2x2x1
jax: 0.10.0
libtpu: 0.0.40
codegen_flags: <defaults>
</compile_context>

<pallas_src>
import jax
import jax.numpy as jnp
from jax.experimental import pallas as pl
from jax.experimental.pallas import tpu as pltpu


_DEFAULT_MIN_PALLAS_BYTES = 1 << 20   # below this, skip the kernel (metadata reshape)

_limits_cache = None


def _tile_limits():
    """(per-buffer tile byte cap, scoped VMEM limit) — chip-gated, cached."""
    global _limits_cache
    if _limits_cache is None:
        tile_bytes = 4 * 1024 * 1024        # v7x-safe default (64 MiB VMEM / TC)
        vmem_limit = 32 * 1024 * 1024
        try:
            cap = getattr(pltpu.get_tpu_info(), "vmem_capacity_bytes", 0)
            if cap and cap >= 100 * 1024 * 1024:     # v5e / v6e: 128 MiB VMEM
                tile_bytes = 8 * 1024 * 1024
                vmem_limit = 64 * 1024 * 1024
        except Exception:
            pass                              # conservative defaults stay
        _limits_cache = (tile_bytes, vmem_limit)
    return _limits_cache


def _copy_kernel(x_ref, o_ref):
    # Pure materialization (the ".contiguous()" copy).
    o_ref[...] = x_ref[...]


def _sublane_multiple(dtype) -> int:
    # 8 rows per vreg for 32-bit, 16 for 16-bit, 32 for 8-bit (sublane packing).
    itemsize = jnp.dtype(dtype).itemsize
    return max(8, 32 // itemsize)


def _tiled_copy(slab: jnp.ndarray) -> jnp.ndarray:
    """Copy a (rows, lane) slab through VMEM using pipelined lane-dense tiles."""
    rows, lane = slab.shape
    itemsize = jnp.dtype(slab.dtype).itemsize
    sub = _sublane_multiple(slab.dtype)
    tile_bytes, vmem_limit = _tile_limits()

    # Largest sublane-aligned row count keeping one tile under the byte cap.
    budget_rows = max(sub, (tile_bytes // (lane * itemsize)) // sub * sub)

    if rows <= sub:
        # Tiny slab: one full-extent block (full-dim exception to (8,128)).
        block_rows = rows
    else:
        # >= ~4 grid steps whenever rows > 4*sub, so in-DMA of block i+1
        # overlaps out-DMA of block i; still capped by the tile byte budget.
        quarter_rows = max(sub, (rows // 4) // sub * sub)
        block_rows = min(budget_rows, quarter_rows)

    num_blocks = pl.cdiv(rows, block_rows)   # ragged last block masked by Pallas

    index_map = lambda i: (i, 0)
    in_spec = pl.BlockSpec((block_rows, lane), index_map)
    if 3 <= num_blocks < 8:
        # Short grid: deepen input buffering to hide pipeline fill/drain.
        try:
            in_spec = pl.BlockSpec((block_rows, lane), index_map,
                                   pipeline_mode=pl.Buffered(3))
        except TypeError:
            pass   # older API: keep default double-buffering

    return pl.pallas_call(
        _copy_kernel,
        out_shape=jax.ShapeDtypeStruct((rows, lane), slab.dtype),
        grid_spec=pltpu.PrefetchScalarGridSpec(
            num_scalar_prefetch=0,
            grid=(num_blocks,),
            in_specs=[in_spec],
            out_specs=pl.BlockSpec((block_rows, lane), index_map),
        ),
        compiler_params=pltpu.CompilerParams(
            # "parallel" = megacore sharding on 2-TC chips (v7x); no-op on 1-TC.
            dimension_semantics=("parallel",),
            vmem_limit_bytes=vmem_limit,
        ),
        cost_estimate=pl.CostEstimate(
            flops=0,
            transcendentals=0,
            bytes_accessed=2 * rows * lane * itemsize,
        ),
    )(slab)


def _pallas_contiguous_copy(flat: jnp.ndarray) -> jnp.ndarray:
    """Copy a 1-D array through the Pallas kernel, preserving order & dtype."""
    n = flat.shape[0]
    if n == 0:
        return flat

    # Widest lane count (multiple of 128) dividing n exactly -> no padding.
    lane = next((c for c in (1024, 512, 256, 128) if n % c == 0), None)
    if lane is not None:
        return _tiled_copy(flat.reshape(n // lane, lane)).reshape(n)

    # Irregular size: copy only the 128-aligned bulk through the kernel and
    # pass the (<128-element) tail through.  No full-array zero-pad concat.
    n_bulk = (n // 128) * 128
    if n_bulk == 0:
        return flat   # fewer than 128 elements: not worth a kernel launch
    bulk_lane = next(c for c in (1024, 512, 256, 128) if n_bulk % c == 0)
    bulk = _tiled_copy(flat[:n_bulk].reshape(n_bulk // bulk_lane, bulk_lane))
    # TODO(synk): fold the ragged tail into the kernel (masked pltpu.store /
    # pl.BoundedSlice) to avoid this small concat entirely.
    return jnp.concatenate([bulk.reshape(n_bulk), flat[n_bulk:]])


class View:
    """JAX/Pallas equivalent of the PyTorch View module."""

    def __init__(self, shape, contiguous=False,
                 min_pallas_bytes=_DEFAULT_MIN_PALLAS_BYTES):
        self.shape = tuple(shape)
        self.contiguous = contiguous
        self.min_pallas_bytes = min_pallas_bytes

    def __call__(self, x: jnp.ndarray) -> jnp.ndarray:
        if not self.contiguous or x.size == 0:
            # x.view(*shape) on a contiguous tensor is metadata-only.
            return x.reshape(self.shape)
        nbytes = x.size * jnp.dtype(x.dtype).itemsize
        if nbytes < self.min_pallas_bytes:
            # JAX arrays are always contiguous, so the copy never changes the
            # value; skip pallas_call launch overhead for tiny tensors.
            return x.reshape(self.shape)
        # .contiguous(): materialize a fresh buffer via the Pallas copy kernel,
        # then the view itself is a metadata reshape.
        return _pallas_contiguous_copy(x.reshape(-1)).reshape(self.shape)


if __name__ == "__main__":
    key = jax.random.PRNGKey(0)

    # Small shape consistent with typical conformer usage: (B, C, H, W).
    x = jax.random.normal(key, (2, 4, 16, 16), dtype=jnp.float32)

    # 1) Force the Pallas copy path even for this small example.
    view = View(shape=(2, 4, 256), contiguous=True, min_pallas_bytes=0)
    y = jax.block_until_ready(view(x))
    ref = x.reshape(2, 4, 256)
    assert y.shape == (2, 4, 256)
    assert y.dtype == x.dtype
    assert bool(jnp.array_equal(y, ref))

    # 2) Default threshold: small input skips the kernel (metadata-only), still correct.
    y2 = jax.block_until_ready(View(shape=(8, -1), contiguous=True)(x))
    assert y2.shape == (8, 256)
    assert bool(jnp.array_equal(y2, x.reshape(8, 256)))

    # 3) Medium slab (512 KiB): exercises the multi-block pipelined path (>=4 steps).
    xb = jax.random.normal(jax.random.PRNGKey(0), (4, 4, 128, 64), dtype=jnp.float32)
    yb = jax.block_until_ready(
        View(shape=(4, 4, 128 * 64), contiguous=True, min_pallas_bytes=0)(xb))
    assert bool(jnp.array_equal(yb, xb.reshape(4, 4, 128 * 64)))

    # 4) Irregular element count (not divisible by 128): bulk kernel + tail pass-through.
    xi = jax.random.normal(jax.random.PRNGKey(0), (2, 3, 5, 7), dtype=jnp.float32)
    yi = jax.block_until_ready(
        View(shape=(6, 35), contiguous=True, min_pallas_bytes=0)(xi))
    assert bool(jnp.array_equal(yi, xi.reshape(6, 35)))

    print("KERNEL_OK")
</pallas_src>

<mosaic_0001>
module attributes {stable_mosaic.version = 11 : i64} {
  func.func @_copy_kernel(%arg0: i32, %arg1: memref<2x1024xf32, #tpu.memory_space<vmem>>, %arg2: memref<2x1024xf32, #tpu.memory_space<vmem>>) attributes {dimension_semantics = [#tpu.dimension_semantics<parallel>], iteration_bounds = array<i64: 1>, scalar_prefetch = 0 : i64, scratch_operands = 0 : i64, tpu.core_type = #tpu.core_type<tc>, window_params = [{transform_indices = @transform_0, window_bounds = array<i64: 2, 1024>}, {transform_indices = @transform_1, window_bounds = array<i64: 2, 1024>}]} {
    %c0 = arith.constant 0 : index
    %c0_0 = arith.constant 0 : index
    %0 = vector.load %arg1[%c0, %c0_0] : memref<2x1024xf32, #tpu.memory_space<vmem>>, vector<2x1024xf32>
    %c0_1 = arith.constant 0 : index
    %c0_2 = arith.constant 0 : index
    %1 = vector.load %arg2[%c0_1, %c0_2] : memref<2x1024xf32, #tpu.memory_space<vmem>>, vector<2x1024xf32>
    tpu.vector_store %arg2[%c0_1, %c0_2], %0 {strides = array<i32>} : memref<2x1024xf32, #tpu.memory_space<vmem>>, vector<2x1024xf32>,
    return
  }
  func.func @transform_0(%arg0: i32) -> (i32, i32) {
    %c0_i32 = arith.constant 0 : i32
    %c0_i32_0 = arith.constant 0 : i32
    return %arg0, %c0_i32 : i32, i32
  }
  func.func @transform_1(%arg0: i32) -> (i32, i32) {
    %c0_i32 = arith.constant 0 : i32
    %c0_i32_0 = arith.constant 0 : i32
    return %arg0, %c0_i32 : i32, i32
  }
}

</mosaic_0001>

<bundles_post_ra>
// kernel: tpu_custom_call.1
= control target key start
LH: loop header
LB: loop body
LE: loop exit
PB: predicated region body
PF: predicated region fallthrough
CT: control target
= control target key end

     0   :  { %6 = vsyncpa [#allocation3], 0  ;;  %s126_s0 = inlined_call_operand.hbm [shape: f32[2,1024], index: 0, kind: input, shape index: {}]   ;;  %s127_s1 = inlined_call_operand.hbm [shape: f32[2,1024], index: 1, kind: output, shape index: {}]  }
   0x1   :  { %7 = vsyncpa [#allocation4], 0  ;;  %s90_s6 = smov [#allocation2]   ;;  %s42_s10 = scalar_lea.hbm %s126_s0, 256 }
   0x2   :  { %s14_s7 = sshll.u32 %s90_s6, 4  ;;  %p43_p0 = scmp.ne.s32.totalorder %s126_s0, %s42_s10  ;;  %s15_s7 = int_to_ptr.vmem [resolvable:$true] %s14_s7 }
   0x3   :  { %p46_p1 = scmp.lt.u32.totalorder %s42_s10, %s126_s0 }
   0x5   :  { %p48_p2 = pnand %p46_p1, %p43_p0 }
   0x7   :  { %51 = shalt.err (!%p48_p2)
}
   0x8   :  { %s52_s15 = scalar_lea.vmem %s15_s7, 256  ;;  %p57_p4 = scmp.lt.s32.totalorder %s15_s7, %s15_s7 }
   0x9   :  { %p53_p3 = scmp.ne.s32.totalorder %s15_s7, %s52_s15  ;;  %p58_p5 = scmp.lt.s32.totalorder %s52_s15, %s52_s15 }
   0xb   :  { %p59_p6 = por %p58_p5, %p57_p4 }
   0xd   :  { %p60_p7 = pnand %p59_p6, %p53_p3 }
   0xf   :  { %63 = shalt.err (!%p60_p7)
}
  0x10   :  { %17 = dma.hbm_to_vmem [thread:$0]  %s126_s0, 256, %s15_s7, [#allocation3]  }
  0x11   :  { %86 = dma.done.wait [#allocation3], 256  }
  0x12   :  { %87 = vsyncadd [#allocation3], 4294967040  ;;  %s91_s18 = smov [#allocation5]   ;;  %v21_v0 = vld [vmem:[#allocation2] sm:$0xff]  ;;  %v22_v1 = vld [vmem:[#allocation2 + $0x8] sm:$0xff] }
  0x13   :  { %s31_s19 = sshll.u32 %s91_s18, 4  ;;  %23 = vst [vmem:[#allocation5] sm:$0xff] %v21_v0  ;;  %24 = vst [vmem:[#allocation5 + $0x8] sm:$0xff] %v22_v1  ;;  %s32_s19 = int_to_ptr.vmem [resolvable:$true] %s31_s19 }
  0x14   :  { %s64_s20 = scalar_lea.vmem %s32_s19, 256  ;;  %p69_p9 = scmp.lt.s32.totalorder %s32_s19, %s32_s19 }
  0x15   :  { %p65_p8 = scmp.ne.s32.totalorder %s32_s19, %s64_s20  ;;  %p70_p10 = scmp.lt.s32.totalorder %s64_s20, %s64_s20 }
  0x17   :  { %p71_p11 = por %p70_p10, %p69_p9 }
  0x19   :  { %p72_p12 = pnand %p71_p11, %p65_p8 }
  0x1b   :  { %75 = shalt.err (!%p72_p12)
}
  0x1c   :  { %s76_s0 = scalar_lea.hbm %s127_s1, 256 }
  0x1d   :  { %p77_p13 = scmp.ne.s32.totalorder %s127_s1, %s76_s0  ;;  %p80_p0 = scmp.lt.u32.totalorder %s76_s0, %s127_s1 }
  0x1f   :  { %p82_p1 = pnand %p80_p0, %p77_p13 }
  0x21   :  { %85 = shalt.err (!%p82_p1)
}
  0x22   :  { %34 = dma.vmem_to_hbm [thread:$0]  %s32_s19, 256, %s127_s1, [#allocation4]  }
  0x23   :  { %88 = dma.done.wait [#allocation4], 256  }
  0x24   :  { %89 = vsyncadd [#allocation4], 4294967040 }
  0x25   :  { %38 = vsyncpa [#allocation3], 1 }
  0x26   :  { %39 = vsyncpa [#allocation4], 1 }

</bundles_post_ra>
